<compile_context>
chip_gen: v7x
topology: tpu7x:2x2x1
jax: 0.10.0
libtpu: 0.0.40
codegen_flags: <defaults>
</compile_context>

<pallas_src>
import math
import numpy as np
import jax
import jax.numpy as jnp
from jax.experimental import pallas as pl
from jax.experimental.pallas import tpu as pltpu

NUM_CLASS = 3
CODE_SIZE = 7
NUM_DIR_BINS = 2
DIR_OFFSET = math.pi / 4.0
DIR_LIMIT_OFFSET = 0.0

LANE = 128                     # anchors per lane-group (one sublane row)
GROUP = LANE * CODE_SIZE       # 896 lanes: 128 anchors x 7 interleaved code channels
MAX_TR = 512                   # max sublane rows per block -> 512*128 = 65536 anchors/block


def _decode_kernel(scale_ref, shift_ref, p_ref, box_ref, lab_ref, out_ref):
    """Decode one (TR, 896) slab of box residuals.

    Lane layout: lane l <-> (anchor a = l // 7, code channel c = l % 7),
    channels being (x, y, z, dx, dy, dz, rot).
    """
    box = box_ref[0]            # (TR, GROUP)  residuals, channel-interleaved on lanes
    labels = lab_ref[0]         # (TR, LANE)   per-anchor dir label in {0, 1}
    scale = scale_ref[...]      # (TR, GROUP)  per-lane anchor scale
    shift = shift_ref[...]      # (TR, GROUP)  per-lane anchor shift
    p = p_ref[...]              # (LANE, GROUP) 0/1 scatter: anchor -> its rotation lane

    lane = jax.lax.broadcasted_iota(jnp.int32, box.shape, 1)
    chan = lane % CODE_SIZE
    is_size = (chan >= 3) & (chan <= 5)       # dx, dy, dz channels
    is_rot = chan == CODE_SIZE - 1            # rotation channel

    # ResidualCoder.decode_torch: sizes are exp-decoded, everything else affine.
    #   x,y: t*diag + xa/ya   z: t*dza + za   sizes: exp(t)*a_size   rot: t + ra
    pre = jnp.where(is_size, jnp.exp(box), box)          # EUP, overlaps DMA
    decoded = pre * scale + shift                         # VPU

    # Scatter per-anchor dir label onto rotation lanes via the (idle) MXU.
    # Exact: labels and p are 0/1 and each output lane has a single term.
    label_g = jnp.dot(labels, p, preferred_element_type=jnp.float32)  # (TR, GROUP)

    period = 2.0 * math.pi / NUM_DIR_BINS
    val = decoded - DIR_OFFSET
    # common_utils.limit_period(val, offset, period) = val - floor(val/period + offset)*period
    dir_rot = val - jnp.floor(val / period + DIR_LIMIT_OFFSET) * period
    fixed = dir_rot + DIR_OFFSET + period * label_g

    out_ref[0] = jnp.where(is_rot, fixed, decoded)   # single full-tile, lane-dense store


def generate_predicted_boxes(cls_preds, box_preds, dir_cls_preds, anchors):
    """JAX/Pallas equivalent of AnchorHeadTemplate.generate_predicted_boxes.

    cls_preds     : (B, H, W, A_loc*NUM_CLASS)
    box_preds     : (B, H, W, A_loc*CODE_SIZE)
    dir_cls_preds : (B, H, W, A_loc*NUM_DIR_BINS)
    anchors       : (A, 7) flattened anchors
    Returns (batch_cls_preds (B, A, NUM_CLASS), batch_box_preds (B, A, 7)).
    """
    B = cls_preds.shape[0]
    A = anchors.shape[0]

    batch_cls_preds = cls_preds.reshape(B, A, NUM_CLASS).astype(jnp.float32)

    # Free reshapes only (NHWC head output is already anchor-major); no transposes.
    box = box_preds.reshape(B, A, CODE_SIZE).astype(jnp.float32)
    dirp = dir_cls_preds.reshape(B, A, NUM_DIR_BINS).astype(jnp.float32)
    anc = anchors.astype(jnp.float32)

    # Tiling: A anchors -> (R rows of 128 anchors), 7 interleaved channels per lane-group.
    r_needed = -(-A // LANE)
    if r_needed <= MAX_TR:
        tr = r_needed                    # whole anchor axis in one block (full-dim block)
        r = r_needed
    else:
        tr = MAX_TR                      # multiple of 8
        r = -(-r_needed // tr) * tr
    a_pad = r * LANE

    if a_pad != A:                       # pad ragged anchor counts (sliced off below)
        box = jnp.pad(box, ((0, 0), (0, a_pad - A), (0, 0)))
        dirp = jnp.pad(dirp, ((0, 0), (0, a_pad - A), (0, 0)))
        anc = jnp.pad(anc, ((0, a_pad - A), (0, 0)))

    box_r = box.reshape(B, r, GROUP)

    # Per-anchor dir label (tiny XLA pass over the smallest tensor); lane-dense (B, R, 128).
    labels_r = jnp.argmax(dirp, axis=-1).astype(jnp.float32).reshape(B, r, LANE)

    # Anchor-derived scale/shift slabs. Anchors are constants in the real model,
    # so these are a one-time precompute in deployment.
    xa, ya, za, dxa, dya, dza, ra = [anc[:, k] for k in range(CODE_SIZE)]
    diag = jnp.sqrt(dxa * dxa + dya * dya)
    ones = jnp.ones_like(diag)
    zeros = jnp.zeros_like(diag)
    scale = jnp.stack([diag, diag, dza, dxa, dya, dza, ones], axis=-1).reshape(r, GROUP)
    shift = jnp.stack([xa, ya, za, zeros, zeros, zeros, ra], axis=-1).reshape(r, GROUP)

    # 0/1 scatter matrix: anchor-within-row a -> lane 7*a + 6 (rotation channel).
    a_idx = jnp.arange(LANE, dtype=jnp.int32)
    l_idx = jnp.arange(GROUP, dtype=jnp.int32)
    p_mat = ((l_idx[None, :] % CODE_SIZE == CODE_SIZE - 1)
             & (l_idx[None, :] // CODE_SIZE == a_idx[:, None])).astype(jnp.float32)

    # Anchor tiles outer, batch inner: scale/shift block index is invariant along the
    # inner axis, so they are fetched once per anchor tile; both axes are independent.
    grid = (r // tr, B)
    out_r = pl.pallas_call(
        _decode_kernel,
        out_shape=jax.ShapeDtypeStruct((B, r, GROUP), jnp.float32),
        grid_spec=pltpu.PrefetchScalarGridSpec(
            num_scalar_prefetch=0,
            grid=grid,
            in_specs=[
                pl.BlockSpec((tr, GROUP), lambda j, b: (j, 0)),        # scale
                pl.BlockSpec((tr, GROUP), lambda j, b: (j, 0)),        # shift
                pl.BlockSpec((LANE, GROUP), lambda j, b: (0, 0)),      # P (loaded once)
                pl.BlockSpec((1, tr, GROUP), lambda j, b: (b, j, 0)),  # box residuals
                pl.BlockSpec((1, tr, LANE), lambda j, b: (b, j, 0)),   # dir labels
            ],
            out_specs=pl.BlockSpec((1, tr, GROUP), lambda j, b: (b, j, 0)),
        ),
        compiler_params=pltpu.CompilerParams(
            dimension_semantics=("parallel", "parallel"),
            vmem_limit_bytes=48 * 1024 * 1024),
    )(scale, shift, p_mat, box_r, labels_r)

    batch_box_preds = out_r.reshape(B, a_pad, CODE_SIZE)
    if a_pad != A:
        batch_box_preds = batch_box_preds[:, :A, :]
    return batch_cls_preds, batch_box_preds


def build_anchors(H, W, pc_range):
    """Deterministic anchors matching AnchorGenerator's (1,H,W,3,2,7) layout."""
    sizes = jnp.array([[3.9, 1.6, 1.56],    # Car
                       [0.8, 0.6, 1.73],    # Pedestrian
                       [1.76, 0.6, 1.73]],  # Cyclist
                      jnp.float32)
    z_centers = jnp.array([-1.78, -0.6, -0.6], jnp.float32)
    rots = jnp.array([0.0, math.pi / 2.0], jnp.float32)
    x = jnp.linspace(pc_range[0], pc_range[3], W)
    y = jnp.linspace(pc_range[1], pc_range[4], H)
    yy, xx = jnp.meshgrid(y, x, indexing="ij")  # (H, W)

    shp = (1, H, W, NUM_CLASS, 2)
    xx_b = jnp.broadcast_to(xx[None, :, :, None, None], shp)
    yy_b = jnp.broadcast_to(yy[None, :, :, None, None], shp)
    zz_b = jnp.broadcast_to(z_centers[None, None, None, :, None], shp)
    dx_b = jnp.broadcast_to(sizes[:, 0][None, None, None, :, None], shp)
    dy_b = jnp.broadcast_to(sizes[:, 1][None, None, None, :, None], shp)
    dz_b = jnp.broadcast_to(sizes[:, 2][None, None, None, :, None], shp)
    rr_b = jnp.broadcast_to(rots[None, None, None, None, :], shp)
    anchors = jnp.stack([xx_b, yy_b, zz_b, dx_b, dy_b, dz_b, rr_b], axis=-1)
    return anchors.reshape(-1, CODE_SIZE)  # (H*W*6, 7)


def _decode_ref(box_preds_flat, anchors_flat, dir_preds_flat):
    """Pure-JAX reference for correctness check."""
    xa, ya, za, dxa, dya, dza, ra = jnp.split(anchors_flat[None], 7, axis=-1)
    xt, yt, zt, dxt, dyt, dzt, rt = jnp.split(box_preds_flat, 7, axis=-1)
    diag = jnp.sqrt(dxa ** 2 + dya ** 2)
    xg = xt * diag + xa
    yg = yt * diag + ya
    zg = zt * dza + za
    dxg = jnp.exp(dxt) * dxa
    dyg = jnp.exp(dyt) * dya
    dzg = jnp.exp(dzt) * dza
    rg = rt + ra
    period = 2.0 * math.pi / NUM_DIR_BINS
    dir_labels = jnp.argmax(dir_preds_flat, axis=-1).astype(jnp.float32)[..., None]
    val = rg - DIR_OFFSET
    dir_rot = val - jnp.floor(val / period + DIR_LIMIT_OFFSET) * period
    rg = dir_rot + DIR_OFFSET + period * dir_labels
    return jnp.concatenate([xg, yg, zg, dxg, dyg, dzg, rg], axis=-1)


if __name__ == "__main__":
    # Small shapes: batch=2, feature map 16x16, 6 anchors/location -> A=1536.
    B, H, W = 2, 16, 16
    A_LOC = NUM_CLASS * 2
    pc_range = [0.0, -39.68, -3.0, 69.12, 39.68, 1.0]

    key = jax.random.PRNGKey(0)
    k1, k2, k3 = jax.random.split(key, 3)
    cls_preds = jax.random.normal(k1, (B, H, W, A_LOC * NUM_CLASS), jnp.float32)
    box_preds = 0.1 * jax.random.normal(k2, (B, H, W, A_LOC * CODE_SIZE), jnp.float32)
    dir_cls_preds = jax.random.normal(k3, (B, H, W, A_LOC * NUM_DIR_BINS), jnp.float32)

    anchors = build_anchors(H, W, pc_range)  # (1536, 7)

    fn = jax.jit(generate_predicted_boxes)
    batch_cls_preds, batch_box_preds = fn(cls_preds, box_preds, dir_cls_preds, anchors)
    jax.block_until_ready(batch_box_preds)

    # correctness check against pure-JAX reference
    A = anchors.shape[0]
    ref = _decode_ref(box_preds.reshape(B, A, CODE_SIZE),
                      anchors,
                      dir_cls_preds.reshape(B, A, NUM_DIR_BINS))
    assert batch_cls_preds.shape == (B, A, NUM_CLASS)
    assert batch_box_preds.shape == (B, A, CODE_SIZE)
    np.testing.assert_allclose(np.asarray(batch_box_preds), np.asarray(ref),
                               rtol=1e-5, atol=1e-5)
    print("KERNEL_OK")
</pallas_src>

<mosaic_0001>
module attributes {stable_mosaic.version = 11 : i64} {
  func.func @_decode_kernel(%arg0: i32, %arg1: i32, %arg2: memref<12x896xf32, #tpu.memory_space<vmem>>, %arg3: memref<12x896xf32, #tpu.memory_space<vmem>>, %arg4: memref<128x896xf32, #tpu.memory_space<vmem>>, %arg5: memref<1x12x896xf32, #tpu.memory_space<vmem>>, %arg6: memref<1x12x128xf32, #tpu.memory_space<vmem>>, %arg7: memref<1x12x896xf32, #tpu.memory_space<vmem>>) attributes {dimension_semantics = [#tpu.dimension_semantics<parallel>, #tpu.dimension_semantics<parallel>], iteration_bounds = array<i64: 1, 2>, scalar_prefetch = 0 : i64, scratch_operands = 0 : i64, tpu.core_type = #tpu.core_type<tc>, window_params = [{transform_indices = @transform_0, window_bounds = array<i64: 12, 896>}, {transform_indices = @transform_1, window_bounds = array<i64: 12, 896>}, {pipeline_mode = #tpu.pipeline_mode<synchronous>, transform_indices = @transform_2, window_bounds = array<i64: 128, 896>}, {transform_indices = @transform_3, window_bounds = array<i64: 1, 12, 896>}, {transform_indices = @transform_4, window_bounds = array<i64: 1, 12, 128>}, {transform_indices = @transform_5, window_bounds = array<i64: 1, 12, 896>}]} {
    %c0 = arith.constant 0 : index
    %c0_0 = arith.constant 0 : index
    %c0_1 = arith.constant 0 : index
    %0 = vector.load %arg5[%c0, %c0_0, %c0_1] : memref<1x12x896xf32, #tpu.memory_space<vmem>>, vector<1x12x896xf32>
    %1 = vector.shape_cast %0 : vector<1x12x896xf32> to vector<12x896xf32>
    %c0_2 = arith.constant 0 : index
    %c0_3 = arith.constant 0 : index
    %c0_4 = arith.constant 0 : index
    %2 = vector.load %arg6[%c0_2, %c0_3, %c0_4] : memref<1x12x128xf32, #tpu.memory_space<vmem>>, vector<1x12x128xf32>
    %3 = vector.shape_cast %2 : vector<1x12x128xf32> to vector<12x128xf32>
    %c0_5 = arith.constant 0 : index
    %c0_6 = arith.constant 0 : index
    %4 = vector.load %arg2[%c0_5, %c0_6] : memref<12x896xf32, #tpu.memory_space<vmem>>, vector<12x896xf32>
    %c0_7 = arith.constant 0 : index
    %c0_8 = arith.constant 0 : index
    %5 = vector.load %arg3[%c0_7, %c0_8] : memref<12x896xf32, #tpu.memory_space<vmem>>, vector<12x896xf32>
    %c0_9 = arith.constant 0 : index
    %c0_10 = arith.constant 0 : index
    %6 = vector.load %arg4[%c0_9, %c0_10] : memref<128x896xf32, #tpu.memory_space<vmem>>, vector<128x896xf32>
    %7 = tpu.iota {dimensions = array<i32: 1>} : vector<12x896xi32>
    %c7_i32 = arith.constant 7 : i32
    %c0_i32 = arith.constant 0 : i32
    %8 = arith.cmpi eq, %c7_i32, %c0_i32 : i32
    %c1_i32 = arith.constant 1 : i32
    %9 = arith.select %8, %c1_i32, %c7_i32 : i32
    %10 = vector.broadcast %9 : i32 to vector<12x896xi32>
    %11 = arith.remsi %7, %10 : vector<12x896xi32>
    %c0_i32_11 = arith.constant 0 : i32
    %12 = vector.broadcast %c0_i32_11 : i32 to vector<12x896xi32>
    %13 = arith.cmpi ne, %11, %12 : vector<12x896xi32>
    %c0_i32_12 = arith.constant 0 : i32
    %14 = vector.broadcast %c0_i32_12 : i32 to vector<12x896xi32>
    %15 = arith.cmpi slt, %11, %14 : vector<12x896xi32>
    %c0_i32_13 = arith.constant 0 : i32
    %16 = arith.cmpi slt, %9, %c0_i32_13 : i32
    %17 = vector.broadcast %16 : i1 to vector<12x896xi1>
    %18 = vector.broadcast %17 : vector<12x896xi1> to vector<12x896xi1>
    %19 = arith.xori %15, %18 : vector<12x896xi1>
    %20 = arith.andi %19, %13 : vector<12x896xi1>
    %21 = vector.broadcast %9 : i32 to vector<12x896xi32>
    %22 = arith.addi %11, %21 : vector<12x896xi32>
    %23 = arith.select %20, %22, %11 : vector<12x896xi1>, vector<12x896xi32>
    %c3_i32 = arith.constant 3 : i32
    %24 = vector.broadcast %c3_i32 : i32 to vector<12x896xi32>
    %25 = arith.cmpi sge, %23, %24 : vector<12x896xi32>
    %c5_i32 = arith.constant 5 : i32
    %26 = vector.broadcast %c5_i32 : i32 to vector<12x896xi32>
    %27 = arith.cmpi sle, %23, %26 : vector<12x896xi32>
    %28 = arith.andi %25, %27 : vector<12x896xi1>
    %c6_i32 = arith.constant 6 : i32
    %29 = vector.broadcast %c6_i32 : i32 to vector<12x896xi32>
    %30 = arith.cmpi eq, %23, %29 : vector<12x896xi32>
    %31 = math.exp %1 : vector<12x896xf32>
    %32 = arith.select %28, %31, %1 : vector<12x896xi1>, vector<12x896xf32>
    %33 = arith.mulf %32, %4 : vector<12x896xf32>
    %34 = arith.addf %33, %5 : vector<12x896xf32>
    %cst = arith.constant dense<0.000000e+00> : vector<12x896xf32>
    %35 = tpu.matmul %3, %6, %cst {dimension_numbers = #tpu.dot_dimension_numbers<[1], [0], [0], [1], [0, 0, 1, 1], [], []>} : vector<12x128xf32>, vector<128x896xf32>, vector<12x896xf32> -> vector<12x896xf32>
    %cst_14 = arith.constant 0.785398185 : f32
    %36 = vector.broadcast %cst_14 : f32 to vector<12x896xf32>
    %37 = arith.subf %34, %36 : vector<12x896xf32>
    %cst_15 = arith.constant 3.14159274 : f32
    %38 = vector.broadcast %cst_15 : f32 to vector<12x896xf32>
    %39 = arith.divf %37, %38 : vector<12x896xf32>
    %cst_16 = arith.constant 0.000000e+00 : f32
    %40 = vector.broadcast %cst_16 : f32 to vector<12x896xf32>
    %41 = arith.addf %39, %40 : vector<12x896xf32>
    %42 = math.floor %41 : vector<12x896xf32>
    %cst_17 = arith.constant 3.14159274 : f32
    %43 = vector.broadcast %cst_17 : f32 to vector<12x896xf32>
    %44 = arith.mulf %42, %43 : vector<12x896xf32>
    %45 = arith.subf %37, %44 : vector<12x896xf32>
    %cst_18 = arith.constant 0.785398185 : f32
    %46 = vector.broadcast %cst_18 : f32 to vector<12x896xf32>
    %47 = arith.addf %45, %46 : vector<12x896xf32>
    %cst_19 = arith.constant 3.14159274 : f32
    %48 = vector.broadcast %cst_19 : f32 to vector<12x896xf32>
    %49 = arith.mulf %48, %35 : vector<12x896xf32>
    %50 = arith.addf %47, %49 : vector<12x896xf32>
    %51 = arith.select %30, %50, %34 : vector<12x896xi1>, vector<12x896xf32>
    %c0_20 = arith.constant 0 : index
    %c0_21 = arith.constant 0 : index
    %c0_22 = arith.constant 0 : index
    %52 = vector.load %arg7[%c0_20, %c0_21, %c0_22] : memref<1x12x896xf32, #tpu.memory_space<vmem>>, vector<1x12x896xf32>
    %53 = vector.shape_cast %52 : vector<1x12x896xf32> to vector<12x896xf32>
    %54 = vector.shape_cast %51 : vector<12x896xf32> to vector<1x12x896xf32>
    tpu.vector_store %arg7[%c0_20, %c0_21, %c0_22], %54 {strides = array<i32>} : memref<1x12x896xf32, #tpu.memory_space<vmem>>, vector<1x12x896xf32>,
    return
  }
  func.func @transform_0(%arg0: i32, %arg1: i32) -> (i32, i32) {
    %c0_i32 = arith.constant 0 : i32
    %c0_i32_0 = arith.constant 0 : i32
    return %arg0, %c0_i32 : i32, i32
  }
  func.func @transform_1(%arg0: i32, %arg1: i32) -> (i32, i32) {
    %c0_i32 = arith.constant 0 : i32
    %c0_i32_0 = arith.constant 0 : i32
    return %arg0, %c0_i32 : i32, i32
  }
  func.func @transform_2(%arg0: i32, %arg1: i32) -> (i32, i32) {
    %c0_i32 = arith.constant 0 : i32
    %c0_i32_0 = arith.constant 0 : i32
    %c0_i32_1 = arith.constant 0 : i32
    return %c0_i32, %c0_i32_0 : i32, i32
  }
  func.func @transform_3(%arg0: i32, %arg1: i32) -> (i32, i32, i32) {
    %c0_i32 = arith.constant 0 : i32
    %c0_i32_0 = arith.constant 0 : i32
    return %arg1, %arg0, %c0_i32 : i32, i32, i32
  }
  func.func @transform_4(%arg0: i32, %arg1: i32) -> (i32, i32, i32) {
    %c0_i32 = arith.constant 0 : i32
    %c0_i32_0 = arith.constant 0 : i32
    return %arg1, %arg0, %c0_i32 : i32, i32, i32
  }
  func.func @transform_5(%arg0: i32, %arg1: i32) -> (i32, i32, i32) {
    %c0_i32 = arith.constant 0 : i32
    %c0_i32_0 = arith.constant 0 : i32
    return %arg1, %arg0, %c0_i32 : i32, i32, i32
  }
}

</mosaic_0001>

<bundles_post_ra>
// kernel: generate_predicted_boxes.1
= control target key start
LH: loop header
LB: loop body
LE: loop exit
PB: predicated region body
PF: predicated region fallthrough
CT: control target
= control target key end

     0   :  { %s1689_s18 = smov 0   ;;  %s1691_s19 = smov 0   ;;  %s2535_s0 = inlined_call_operand.vmem [shape: f32[12,896], index: 0, kind: input, shape index: {}]   ;;  %s2536_s1 = inlined_call_operand.vmem [shape: f32[12,896], index: 1, kind: input, shape index: {}]   ;;  %s2537_s2 = inlined_call_operand.vmem [shape: f32[128,896], index: 2, kind: input, shape index: {}]   ;;  %s2538_s3 = inlined_call_operand.vmem [shape: f32[2,12,896], index: 3, kind: input, shape index: {}]   ;;  %s2539_s4 = inlined_call_operand.vmem [shape: f32[2,12,128], index: 4, kind: input, shape index: {}]   ;;  %s2540_s5 = inlined_call_operand.vmem [shape: f32[2,12,896], index: 5, kind: output, shape index: {}]  }
   0x1   :  { %s1693_s20 = smov 0  }
   0x2 LB: > { %s24_s21 = sadd.s32 1, %s1651_s19  ;;  %p1361_p0 = scmp.ge.s32.totalorder %s1655_s20, 1  ;;  %s1655_s20 = sphi %s1693_s20, %s15_s20   ;;  %s1651_s19 = sphi %s1691_s19, %s2556_s19   ;;  %s1647_s18 = sphi %s1689_s18, %s2555_s18  }
   0x3   : > { %p25_p1 = scmp.ge.s32.totalorder %s24_s21, 2  ;;  %p250_p2 = scmp.lt.s32.totalorder %s1655_s20, 3 }
   0x5   : > { %s2558_s21 = smov (%p25_p1, %s24_s21), 0  ;;  %p251_p3 = pnand %p1361_p0, %p250_p2 }
   0x6   : > { %v400_v0 = vld [vmem:[%s2537_s2 + $0x8] sm:$0xff] (!%p251_p3)  ;;  %v407_v1 = vld [vmem:[%s2537_s2 + $0x40] sm:$0xff] (!%p251_p3)  ;;  %v406_v4 = vld [vmem:[%s2537_s2 + $0x38] sm:$0xff] (!%p251_p3)  ;;  %v1657_v7 = vmov (!%p251_p3), 0.0   ;;  %p324_p4 = scmp.lt.s32.totalorder (!%p251_p3), %s1647_s18, 1 }
   0x7   : > { %254 = sbr.rel (%p251_p3) target bundleno = 296 (0x128), region = 40  ;;  %v399_v2 = vld [vmem:[%s2537_s2] sm:$0xff] (!%p251_p3)  ;;  %v1436_v3 = vpack.c.bf16 (!%p251_p3), %v407_v1, %v400_v0  ;;  %v402_v5 = vld [vmem:[%s2537_s2 + $0x18] sm:$0xff] (!%p251_p3)  ;;  %v409_v6 = vld [vmem:[%s2537_s2 + $0x50] sm:$0xff] (!%p251_p3)  ;;  %814 = vmatprep.mubr.f32.mxu0 (!%p251_p3), %v1657_v7  ;;  %891 = vmatprep.mubr.f32.mxu1 (!%p251_p3), %v1657_v7 }
   0x8   : > { %v1438_v8 = vpack.c.bf16 (!%p251_p3), %v406_v4, %v399_v2  ;;  %v1468_v9 = vpack.c.bf16 (!%p251_p3), %v409_v6, %v402_v5  ;;  %v414_v10 = vld [vmem:[%s2537_s2 + $0x78] sm:$0xff] (!%p251_p3)  ;;  %v421_v11 = vld [vmem:[%s2537_s2 + $0xb0] sm:$0xff] (!%p251_p3)  ;;  %v408_v14 = vld [vmem:[%s2537_s2 + $0x48] sm:$0xff] (!%p251_p3) }
   0x9   : > { %v401_v12 = vld [vmem:[%s2537_s2 + $0x10] sm:$0xff] (!%p251_p3)  ;;  %1437 = vmatprep.subr.bf16.mxu0 (!%p251_p3), %v1436_v3  ;;  %v1440_v13 = vpack.c.bf16 (!%p251_p3), %v421_v11, %v414_v10  ;;  %v420_v16 = vld [vmem:[%s2537_s2 + $0xa8] sm:$0xff] (!%p251_p3)  ;;  %v423_v20 = vld [vmem:[%s2537_s2 + $0xc0] sm:$0xff] (!%p251_p3) }
   0xa   : > { %v413_v15 = vld [vmem:[%s2537_s2 + $0x70] sm:$0xff] (!%p251_p3)  ;;  %1439 = vmatpush1.bf16.msra.mxu0 (!%p251_p3), %v1438_v8  ;;  %1469 = vmatprep.subr.bf16.mxu1 (!%p251_p3), %v1468_v9  ;;  %v1470_v17 = vpack.c.bf16 (!%p251_p3), %v408_v14, %v401_v12  ;;  %v416_v19 = vld [vmem:[%s2537_s2 + $0x88] sm:$0xff] (!%p251_p3)  ;;  %v435_v23 = vld [vmem:[%s2537_s2 + $0x120] sm:$0xff] (!%p251_p3) }
   0xb   : > { %v1442_v18 = vpack.c.bf16 (!%p251_p3), %v420_v16, %v413_v15  ;;  %v428_v21 = vld [vmem:[%s2537_s2 + $0xe8] sm:$0xff] (!%p251_p3)  ;;  %1441 = vmatprep.subr.bf16.mxu0 (!%p251_p3), %v1440_v13  ;;  %v1472_v22 = vpack.c.bf16 (!%p251_p3), %v423_v20, %v416_v19  ;;  %v415_v24 = vld [vmem:[%s2537_s2 + $0x80] sm:$0xff] (!%p251_p3)  ;;  %v422_v25 = vld [vmem:[%s2537_s2 + $0xb8] sm:$0xff] (!%p251_p3) }
   0xc   : > { %1471 = vmatpush1.bf16.msra.mxu1 (!%p251_p3), %v1470_v17  ;;  %v1444_v26 = vpack.c.bf16 (!%p251_p3), %v435_v23, %v428_v21  ;;  %v1474_v27 = vpack.c.bf16 (!%p251_p3), %v422_v25, %v415_v24  ;;  %v427_v28 = vld [vmem:[%s2537_s2 + $0xe0] sm:$0xff] (!%p251_p3)  ;;  %v434_v29 = vld [vmem:[%s2537_s2 + $0x118] sm:$0xff] (!%p251_p3)  ;;  %v437_v31 = vld [vmem:[%s2537_s2 + $0x130] sm:$0xff] (!%p251_p3) }
   0xd   : > { %v430_v30 = vld [vmem:[%s2537_s2 + $0xf8] sm:$0xff] (!%p251_p3)  ;;  %1473 = vmatprep.subr.bf16.mxu1 (!%p251_p3), %v1472_v22  ;;  %v449_v33 = vld [vmem:[%s2537_s2 + $0x190] sm:$0xff] (!%p251_p3)  ;;  %v1446_v34 = vpack.c.bf16 (!%p251_p3), %v434_v29, %v427_v28  ;;  %v436_v37 = vld [vmem:[%s2537_s2 + $0x128] sm:$0xff] (!%p251_p3) }
   0xe   : > { %v442_v32 = vld [vmem:[%s2537_s2 + $0x158] sm:$0xff]  ;;  %1443 = vmatpush1.bf16.msra.mxu0 %v1442_v18  ;;  %v1476_v35 = vpack.c.bf16 %v437_v31, %v430_v30  ;;  %v429_v36 = vld [vmem:[%s2537_s2 + $0xf0] sm:$0xff]  ;;  %v448_v40 = vld [vmem:[%s2537_s2 + $0x188] sm:$0xff]  ;;  %s2560_s18 = smov (!%p324_p4, %s1647_s18), 1 }
   0xf   : > { %v441_v38 = vld [vmem:[%s2537_s2 + $0x150] sm:$0xff]  ;;  %1445 = vmatprep.subr.bf16.mxu0 %v1444_v26  ;;  %v1448_v39 = vpack.c.bf16 %v449_v33, %v442_v32  ;;  %v444_v41 = vld [vmem:[%s2537_s2 + $0x168] sm:$0xff]  ;;  %v451_v42 = vld [vmem:[%s2537_s2 + $0x1a0] sm:$0xff]  ;;  %v1478_v43 = vpack.c.bf16 %v436_v37, %v429_v36  ;;  %s1382_s16 = sshll.u32 %s2560_s18, 4  ;;  %s1564_s17 = smul.u32 112, %s2560_s18 }
  0x10   : > { %1475 = vmatpush1.bf16.msra.mxu1 %v1474_v27  ;;  %v456_v44 = vld [vmem:[%s2537_s2 + $0x1c8] sm:$0xff]  ;;  %v463_v45 = vld [vmem:[%s2537_s2 + $0x200] sm:$0xff]  ;;  %v1480_v46 = vpack.c.bf16 %v451_v42, %v444_v41  ;;  %v450_v48 = vld [vmem:[%s2537_s2 + $0x198] sm:$0xff]  ;;  %v1450_v49 = vpack.c.bf16 %v448_v40, %v441_v38  ;;  %s342_s10 = scalar_lea.vmem %s2539_s4, %s1382_s16 }
  0x11   : > { %1477 = vmatprep.subr.bf16.mxu1 %v1476_v35  ;;  %v443_v47 = vld [vmem:[%s2537_s2 + $0x160] sm:$0xff]  ;;  %v458_v50 = vld [vmem:[%s2537_s2 + $0x1d8] sm:$0xff]  ;;  %v465_v51 = vld [vmem:[%s2537_s2 + $0x210] sm:$0xff]  ;;  %v1452_v52 = vpack.c.bf16 %v463_v45, %v456_v44  ;;  %s2103_s16 = scalar_lea.vmem %s2538_s3, %s1564_s17  ;;  %s2421_s28 = scalar_lea.vmem %s2540_s5, %s1564_s17 }
  0x12   : > { %1447 = vmatpush1.bf16.msra.mxu0 %v1446_v34  ;;  %v455_v53 = vld [vmem:[%s2537_s2 + $0x1c0] sm:$0xff]  ;;  %v462_v54 = vld [vmem:[%s2537_s2 + $0x1f8] sm:$0xff]  ;;  %v1482_v55 = vpack.c.bf16 %v450_v48, %v443_v47  ;;  %v477_v57 = vld [vmem:[%s2537_s2 + $0x270] sm:$0xff]  ;;  %v1484_v58 = vpack.c.bf16 %v465_v51, %v458_v50 }
  0x13   : > { %1449 = vmatprep.subr.bf16.mxu0 %v1448_v39  ;;  %v470_v56 = vld [vmem:[%s2537_s2 + $0x238] sm:$0xff]  ;;  %v457_v59 = vld [vmem:[%s2537_s2 + $0x1d0] sm:$0xff]  ;;  %v464_v60 = vld [vmem:[%s2537_s2 + $0x208] sm:$0xff]  ;;  %v1454_v61 = vpack.c.bf16 %v462_v54, %v455_v53 }
  0x14   : > { %1479 = vmatpush1.bf16.msra.mxu1 %v1478_v43  ;;  %v472_v62 = vld [vmem:[%s2537_s2 + $0x248] sm:$0xff]  ;;  %v479_v63 = vld [vmem:[%s2537_s2 + $0x280] sm:$0xff]  ;;  %v1456_v0 = vpack.c.bf16 %v477_v57, %v470_v56  ;;  %v469_v1 = vld [vmem:[%s2537_s2 + $0x230] sm:$0xff]  ;;  %v1486_v3 = vpack.c.bf16 %v464_v60, %v457_v59 }
  0x15   : > { %1481 = vmatprep.subr.bf16.mxu1 %v1480_v46  ;;  %v476_v2 = vld [vmem:[%s2537_s2 + $0x268] sm:$0xff]  ;;  %v491_v5 = vld [vmem:[%s2537_s2 + $0x2e0] sm:$0xff]  ;;  %v1488_v6 = vpack.c.bf16 %v479_v63, %v472_v62  ;;  %v478_v9 = vld [vmem:[%s2537_s2 + $0x278] sm:$0xff] }
  0x16   : > { %1451 = vmatpush1.bf16.msra.mxu0 %v1450_v49  ;;  %v484_v4 = vld [vmem:[%s2537_s2 + $0x2a8] sm:$0xff]  ;;  %v471_v8 = vld [vmem:[%s2537_s2 + $0x240] sm:$0xff]  ;;  %v1458_v10 = vpack.c.bf16 %v476_v2, %v469_v1  ;;  %v486_v11 = vld [vmem:[%s2537_s2 + $0x2b8] sm:$0xff] }
  0x17   : > { %1453 = vmatprep.subr.bf16.mxu0 %v1452_v52  ;;  %v493_v12 = vld [vmem:[%s2537_s2 + $0x2f0] sm:$0xff]  ;;  %v1460_v13 = vpack.c.bf16 %v491_v5, %v484_v4  ;;  %v483_v14 = vld [vmem:[%s2537_s2 + $0x2a0] sm:$0xff]  ;;  %v490_v15 = vld [vmem:[%s2537_s2 + $0x2d8] sm:$0xff]  ;;  %v1490_v16 = vpack.c.bf16 %v478_v9, %v471_v8 }
  0x18   : > { %1483 = vmatpush1.bf16.msra.mxu1 %v1482_v55  ;;  %v498_v17 = vld [vmem:[%s2537_s2 + $0x318] sm:$0xff]  ;;  %v505_v18 = vld [vmem:[%s2537_s2 + $0x350] sm:$0xff]  ;;  %v1492_v19 = vpack.c.bf16 %v493_v12, %v486_v11  ;;  %v492_v21 = vld [vmem:[%s2537_s2 + $0x2e8] sm:$0xff]  ;;  %v1462_v22 = vpack.c.bf16 %v490_v15, %v483_v14 }
  0x19   : > { %1485 = vmatprep.subr.bf16.mxu1 %v1484_v58  ;;  %v485_v20 = vld [vmem:[%s2537_s2 + $0x2b0] sm:$0xff]  ;;  %v500_v23 = vld [vmem:[%s2537_s2 + $0x328] sm:$0xff]  ;;  %v507_v24 = vld [vmem:[%s2537_s2 + $0x360] sm:$0xff]  ;;  %v1464_v25 = vpack.c.bf16 %v505_v18, %v498_v17 }
  0x1a   : > { %1455 = vmatpush1.bf16.msra.mxu0 %v1454_v61  ;;  %v497_v26 = vld [vmem:[%s2537_s2 + $0x310] sm:$0xff]  ;;  %v504_v27 = vld [vmem:[%s2537_s2 + $0x348] sm:$0xff]  ;;  %v1494_v28 = vpack.c.bf16 %v492_v21, %v485_v20  ;;  %v411_v30 = vld [vmem:[%s2537_s2 + $0x60] sm:$0xff]  ;;  %v1496_v31 = vpack.c.bf16 %v507_v24, %v500_v23 }
  0x1b   : > { %1457 = vmatprep.subr.bf16.mxu0 %v1456_v0  ;;  %v404_v29 = vld [vmem:[%s2537_s2 + $0x28] sm:$0xff]  ;;  %v499_v32 = vld [vmem:[%s2537_s2 + $0x320] sm:$0xff]  ;;  %v506_v33 = vld [vmem:[%s2537_s2 + $0x358] sm:$0xff]  ;;  %v1466_v34 = vpack.c.bf16 %v504_v27, %v497_v26 }
  0x1c   : > { %1487 = vmatpush1.bf16.msra.mxu1 %v1486_v3  ;;  %v405_v35 = vld [vmem:[%s2537_s2 + $0x30] sm:$0xff]  ;;  %v412_v36 = vld [vmem:[%s2537_s2 + $0x68] sm:$0xff]  ;;  %v1500_v37 = vpack.c.bf16 %v411_v30, %v404_v29  ;;  %v403_v38 = vld [vmem:[%s2537_s2 + $0x20] sm:$0xff]  ;;  %v1498_v40 = vpack.c.bf16 %v506_v33, %v499_v32 }
  0x1d   : > { %1489 = vmatprep.subr.bf16.mxu1 %v1488_v6  ;;  %v410_v39 = vld [vmem:[%s2537_s2 + $0x58] sm:$0xff]  ;;  %v425_v42 = vld [vmem:[%s2537_s2 + $0xd0] sm:$0xff]  ;;  %v1532_v43 = vpack.c.bf16 %v412_v36, %v405_v35  ;;  %v1937_v44 = vld [vmem:[%s342_s10] sm:$0xff] }
  0x1e   : > { %1459 = vmatpush1.bf16.msra.mxu0 %v1458_v10  ;;  %v418_v41 = vld [vmem:[%s2537_s2 + $0x98] sm:$0xff]  ;;  %v1502_v45 = vpack.c.bf16 %v410_v39, %v403_v38  ;;  %v419_v46 = vld [vmem:[%s2537_s2 + $0xa0] sm:$0xff]  ;;  %v417_v49 = vld [vmem:[%s2537_s2 + $0x90] sm:$0xff] }
  0x1f   : > { %1461 = vmatprep.subr.bf16.mxu0 %v1460_v13  ;;  %v426_v47 = vld [vmem:[%s2537_s2 + $0xd8] sm:$0xff]  ;;  %v1504_v48 = vpack.c.bf16 %v425_v42, %v418_v41  ;;  %v424_v50 = vld [vmem:[%s2537_s2 + $0xc8] sm:$0xff]  ;;  %v439_v52 = vld [vmem:[%s2537_s2 + $0x140] sm:$0xff] }
  0x20   : > { %1491 = vmatpush1.bf16.msra.mxu1 %v1490_v16  ;;  %v432_v51 = vld [vmem:[%s2537_s2 + $0x108] sm:$0xff]  ;;  %v1536_v53 = vpack.c.bf16 %v426_v47, %v419_v46  ;;  %v1506_v54 = vpack.c.bf16 %v424_v50, %v417_v49  ;;  %v433_v55 = vld [vmem:[%s2537_s2 + $0x110] sm:$0xff]  ;;  %v431_v59 = vld [vmem:[%s2537_s2 + $0x100] sm:$0xff]  ;;  %v511_v46 = vlaneseq }
  0x21   : > { %1493 = vmatprep.subr.bf16.mxu1 %v1492_v19  ;;  %v440_v56 = vld [vmem:[%s2537_s2 + $0x148] sm:$0xff]  ;;  %v1508_v58 = vpack.c.bf16 %v439_v52, %v432_v51  ;;  %v438_v60 = vld [vmem:[%s2537_s2 + $0x138] sm:$0xff]  ;;  %v453_v62 = vld [vmem:[%s2537_s2 + $0x1b0] sm:$0xff]  ;;  %v1658_v51 = vmov 0  }
  0x22   : > { %1463 = vmatpush1.bf16.msra.mxu0 %v1462_v22  ;;  %v1965_v57 = vld [vmem:[%s342_s10 + $0x8] sm:$0xf]  ;;  %v446_v61 = vld [vmem:[%s2537_s2 + $0x178] sm:$0xff]  ;;  %v1540_v63 = vpack.c.bf16 %v440_v56, %v433_v55  ;;  %v1510_v0 = vpack.c.bf16 %v438_v60, %v431_v59  ;;  %v447_v1 = vld [vmem:[%s2537_s2 + $0x180] sm:$0xff]  ;;  %v2073_v47 = vand.u32 127, %v511_v46 }
  0x23   : > { %1465 = vmatprep.subr.bf16.mxu0 %v1464_v25  ;;  %v454_v2 = vld [vmem:[%s2537_s2 + $0x1b8] sm:$0xff]  ;;  %v1512_v3 = vpack.c.bf16 %v453_v62, %v446_v61  ;;  %v445_v4 = vld [vmem:[%s2537_s2 + $0x170] sm:$0xff]  ;;  %v452_v5 = vld [vmem:[%s2537_s2 + $0x1a8] sm:$0xff] }
  0x24   : > { %1495 = vmatpush1.bf16.msra.mxu1 %v1494_v28  ;;  %v460_v6 = vld [vmem:[%s2537_s2 + $0x1e8] sm:$0xff]  ;;  %v467_v8 = vld [vmem:[%s2537_s2 + $0x220] sm:$0xff]  ;;  %v1544_v9 = vpack.c.bf16 %v454_v2, %v447_v1  ;;  %v1514_v10 = vpack.c.bf16 %v452_v5, %v445_v4  ;;  %v461_v11 = vld [vmem:[%s2537_s2 + $0x1f0] sm:$0xff]  ;;  %v513_v50 = vadd.s32 128, %v2073_v47  ;;  %v515_v52 = vadd.s32 384, %v2073_v47 }
  0x25   : > { %1497 = vmatprep.subr.bf16.mxu1 %v1496_v31  ;;  %v468_v12 = vld [vmem:[%s2537_s2 + $0x228] sm:$0xff]  ;;  %v1516_v13 = vpack.c.bf16 %v467_v8, %v460_v6  ;;  %v459_v14 = vld [vmem:[%s2537_s2 + $0x1e0] sm:$0xff]  ;;  %v466_v15 = vld [vmem:[%s2537_s2 + $0x218] sm:$0xff] }
  0x26   : > { %1467 = vmatpush1.bf16.msra.mxu0 %v1466_v34  ;;  %v474_v16 = vld [vmem:[%s2537_s2 + $0x258] sm:$0xff]  ;;  %v481_v17 = vld [vmem:[%s2537_s2 + $0x290] sm:$0xff]  ;;  %v1548_v18 = vpack.c.bf16 %v468_v12, %v461_v11  ;;  %v1518_v19 = vpack.c.bf16 %v466_v15, %v459_v14  ;;  %v475_v20 = vld [vmem:[%s2537_s2 + $0x260] sm:$0xff] }
  0x27   : > { %1501 = vmatprep.subr.bf16.mxu0 %v1500_v37  ;;  %v482_v21 = vld [vmem:[%s2537_s2 + $0x298] sm:$0xff]  ;;  %v1520_v22 = vpack.c.bf16 %v481_v17, %v474_v16  ;;  %v473_v23 = vld [vmem:[%s2537_s2 + $0x250] sm:$0xff]  ;;  %v480_v24 = vld [vmem:[%s2537_s2 + $0x288] sm:$0xff] }
  0x28   : > { %1499 = vmatpush1.bf16.msra.mxu1 %v1498_v40  ;;  %v488_v25 = vld [vmem:[%s2537_s2 + $0x2c8] sm:$0xff]  ;;  %v495_v26 = vld [vmem:[%s2537_s2 + $0x300] sm:$0xff]  ;;  %v1552_v27 = vpack.c.bf16 %v482_v21, %v475_v20  ;;  %v1522_v28 = vpack.c.bf16 %v480_v24, %v473_v23  ;;  %v489_v29 = vld [vmem:[%s2537_s2 + $0x2d0] sm:$0xff]  ;;  %v2128_v24 = vadd.s32 512, %v2073_v47 }
  0x29   : > { %815 = vmatmul.mubr.f32.vlgmr.msra.gmra.mrb[0].mxu0 %v1937_v44  ;;  %1533 = vmatprep.subr.bf16.mxu1 %v1532_v43  ;;  %v496_v30 = vld [vmem:[%s2537_s2 + $0x308] sm:$0xff]  ;;  %v1524_v31 = vpack.c.bf16 %v495_v26, %v488_v25  ;;  %v487_v32 = vld [vmem:[%s2537_s2 + $0x2c0] sm:$0xff]  ;;  %v494_v33 = vld [vmem:[%s2537_s2 + $0x2f8] sm:$0xff] }
  0x2a   : > { %1503 = vmatpush1.bf16.msra.mxu0 %v1502_v45  ;;  %820 = vmatprep.mubr.f32.mxu0 %v1657_v7  ;;  %v502_v34 = vld [vmem:[%s2537_s2 + $0x338] sm:$0xff]  ;;  %v509_v35 = vld [vmem:[%s2537_s2 + $0x370] sm:$0xff]  ;;  %v1556_v36 = vpack.c.bf16 %v496_v30, %v489_v29  ;;  %v1526_v37 = vpack.c.bf16 %v494_v33, %v487_v32  ;;  %v503_v38 = vld [vmem:[%s2537_s2 + $0x340] sm:$0xff] }
  0x2b   : > { %892 = vmatmul.mubr.f32.vlgmr.msra.gmra.mrb[0].mxu1 %v1937_v44  ;;  %1505 = vmatprep.subr.bf16.mxu0 %v1504_v48  ;;  %v510_v39 = vld [vmem:[%s2537_s2 + $0x378] sm:$0xff]  ;;  %v1528_v40 = vpack.c.bf16 %v509_v35, %v502_v34  ;;  %v501_v41 = vld [vmem:[%s2537_s2 + $0x330] sm:$0xff]  ;;  %v508_v42 = vld [vmem:[%s2537_s2 + $0x368] sm:$0xff]  ;;  %v2076_v48 = vmul.u32.u64.low 2454267026, %v2073_v47  ;;  %v2077_v49 = vmul.u32.u64.high 2454267026, %v2073_v47, %v2076_v48 }
  0x2c   : > { %1535 = vmatpush3.bf16.msra.mxu1 %v1532_v43  ;;  %897 = vmatprep.mubr.f32.mxu1 %v1657_v7  ;;  %v1560_v43 = vpack.c.bf16 %v510_v39, %v503_v38  ;;  %v1530_v45 = vpack.c.bf16 %v508_v42, %v501_v41  ;;  %v2109_v5 = vld [vmem:[%s2103_s16] sm:$0xff]  ;;  %v2113_v14 = vld [vmem:[%s2103_s16 + $0x8] sm:$0xff]  ;;  %v2122_v21 = vld [vmem:[%s2103_s16 + $0x18] sm:$0xff] }
  0x2d   : > { %1537 = vmatprep.subr.bf16.mxu1 %v1536_v53  ;;  %821 = vmatmul.mubr.f32.gmra.mrb[2].mxu0 %v1965_v57  ;;  %vm525_vm0 = vc.u32 %v2076_v48, 2454267026  ;;  %v686_v25 = vmul.f32 1.442695, %v2122_v21  ;;  %v2132_v26 = vld [vmem:[%s2103_s16 + $0x38] sm:$0xf] }
  0x2e   : > { %1507 = vmatpush1.bf16.msra.mxu0 %v1506_v54  ;;  %968 = vmatprep.mubr.f32.mxu0 %v1657_v7  ;;  %v2084_v54 = vmul.u32.u64.low 2454267026, %v513_v50  ;;  %v2085_v55 = vmul.u32.u64.high 2454267026, %v513_v50, %v2084_v54  ;;  %v2145_v32 = vld [vmem:[%s2103_s16 + $0x48] sm:$0xf]  ;;  %v694_v33 = vmul.f32 1.442695, %v2132_v26 }
  0x2f   : > { %1509 = vmatprep.subr.bf16.mxu0 %v1508_v58  ;;  %898 = vmatmul.mubr.f32.gmra.mrb[2].mxu1 %v1965_v57  ;;  %v2090_v58 = vmul.u32.u64.low 2454267026, %v515_v52  ;;  %v2091_v59 = vmul.u32.u64.high 2454267026, %v515_v52, %v2090_v58  ;;  %v2150_v34 = vld [vmem:[%s2103_s16 + $0x50] sm:$0xf]  ;;  %v2169_v48 = vadd.s32 768, %v2073_v47 }
  0x30   : > { %1539 = vmatpush3.bf16.msra.mxu1 %v1536_v53  ;;  %1433 = vmatprep.mubr.f32.mxu1 %v1937_v44  ;;  %vm539_vm1 = vc.u32 %v2084_v54, 2454267026  ;;  %v380_v29 = vld [vmem:[%s2535_s0 + $0x48] sm:$0xf] }
  0x31   : > { %1541 = vmatprep.subr.bf16.mxu1 %v1540_v63  ;;  %vm567_vm3 = vc.u32 %v2090_v58, 2454267026  ;;  %v540_v61 = vsel %vm539_vm1, 1, %v1658_v51 }
  0x32   : > { %1511 = vmatpush1.bf16.msra.mxu0 %v1510_v0  ;;  %v568_v0 = vsel %vm567_vm3, 1, %v1658_v51  ;;  %v541_v1 = vadd.s32 %v2085_v55, %v540_v61 }
  0x33   : > { %1513 = vmatprep.subr.bf16.mxu0 %v1512_v3  ;;  %v569_v4 = vadd.s32 %v2091_v59, %v568_v0 }
  0x34   : > { %1543 = vmatpush3.bf16.msra.mxu1 %v1540_v63  ;;  %v542_v6 = vshrl.u32 %v541_v1, 2 }
  0x35   : > { %1545 = vmatprep.subr.bf16.mxu1 %v1544_v9 }
  0x36   : > { %1515 = vmatpush1.bf16.msra.mxu0 %v1514_v10  ;;  %v680_v10 = vmul.f32 1.442695, %v2109_v5  ;;  %v543_v12 = vmul.u32 7, %v542_v6 }
  0x37   : > { %1517 = vmatprep.subr.bf16.mxu0 %v1516_v13 }
  0x38   : > { %1547 = vmatpush3.bf16.msra.mxu1 %v1544_v9  ;;  %v570_v9 = vshrl.u32 %v569_v4, 2  ;;  %1605 = vpow2.f32 %v680_v10  ;;  %v544_v17 = vsub.s32 %v513_v50, %v543_v12 }
  0x39   : > { %1549 = vmatprep.subr.bf16.mxu1 %v1548_v18 }
  0x3a   : > { %1519 = vmatpush1.bf16.msra.mxu0 %v1518_v19  ;;  %v571_v15 = vmul.u32 7, %v570_v9  ;;  %v682_v19 = vmul.f32 1.442695, %v2113_v14  ;;  %vm618_vm9 = vcmp.ne.s32.totalorder %v544_v17, 0  ;;  %vm625_vm10 = vcmp.lt.s32.totalorder %v544_v17, 0 }
  0x3b   : > { %1521 = vmatprep.subr.bf16.mxu0 %v1520_v22  ;;  %v639_v30 = vadd.s32 7, %v544_v17 }
  0x3c   : > { %1551 = vmatpush3.bf16.msra.mxu1 %v1548_v18  ;;  %v2118_v18 = vld [vmem:[%s2103_s16 + $0x10] sm:$0xff]  ;;  %v572_v22 = vsub.s32 %v515_v52, %v571_v15  ;;  %1607 = vpow2.f32 %v682_v19 }
  0x3d   : > { %1553 = vmatprep.subr.bf16.mxu1 %v1552_v27  ;;  %v684_v23 = vmul.f32 1.442695, %v2118_v18  ;;  %v387_v19 = vld [vmem:[%s2536_s1 + $0x10] sm:$0xff] }
  0x3e   : > { %1523 = vmatpush1.bf16.msra.mxu0 %v1522_v28  ;;  %v2138_v28 = vadd.s32 640, %v2073_v47  ;;  %vm620_vm14 = vcmp.ne.s32.totalorder %v572_v22, 0  ;;  %vm627_vm15 = vcmp.lt.s32.totalorder %v572_v22, 0 }
  0x3f   : > { %1525 = vmatprep.subr.bf16.mxu0 %v1524_v31  ;;  %1609 = vpow2.f32 %v684_v23  ;;  %v379_v23 = vld [vmem:[%s2535_s0 + $0x40] sm:$0xf] }
  0x40   : > { %1555 = vmatpush3.bf16.msra.mxu1 %v1552_v27  ;;  %v2135_v27 = vld [vmem:[%s2103_s16 + $0x40] sm:$0xf]  ;;  %1611 = vpow2.f32 %v686_v25  ;;  %v2160_v41 = vmul.u32.u64.low 2454267026, %v2138_v28  ;;  %v2161_v42 = vmul.u32.u64.high 2454267026, %v2138_v28, %v2160_v41 }
  0x41   : > { %1557 = vmatprep.subr.bf16.mxu1 %v1556_v36  ;;  %v696_v38 = vmul.f32 1.442695, %v2135_v27  ;;  %1613 = vpow2.f32 %v694_v33 }
  0x42   : > { %1527 = vmatpush1.bf16.msra.mxu0 %v1526_v37  ;;  %v641_v37 = vadd.s32 7, %v572_v22  ;;  %v1606_v39 = vpop.eup %1605 }
  0x43   : > { %1529 = vmatprep.subr.bf16.mxu0 %v1528_v40  ;;  %v698_v40 = vmul.f32 1.442695, %v2145_v32  ;;  %1615 = vpow2.f32 %v696_v38 }
  0x44   : > { %1559 = vmatpush3.bf16.msra.mxu1 %v1556_v36  ;;  %v2153_v35 = vmul.u32.u64.low 2454267026, %v2128_v24  ;;  %v2154_v36 = vmul.u32.u64.high 2454267026, %v2128_v24, %v2153_v35 }
  0x45   : > { %1561 = vmatprep.subr.bf16.mxu1 %v1560_v43  ;;  %1617 = vpow2.f32 %v698_v40 }
  0x46   : > { %1531 = vmatpush1.bf16.msra.mxu0 %v1530_v45  ;;  %v700_v45 = vmul.f32 1.442695, %v2150_v34  ;;  %vm581_vm3 = vc.u32 %v2153_v35, 2454267026 }
  0x48   : > { %1563 = vmatpush3.bf16.msra.mxu1 %v1560_v43  ;;  %1619 = vpow2.f32 %v700_v45 }
  0x49   : > { %969 = vmatmul.mubr.f32.vlgmr.msra.gmra.mrb[4].mxu0 %v1937_v44  ;;  %v526_v44 = vsel %vm525_vm0, 1, %v1658_v51  ;;  %vm632_vm0 = vmand %vm625_vm10, %vm618_vm9 }
  0x4a   : > { %974 = vmatprep.mubr.f32.mxu0 %v1657_v7  ;;  %v514_v7 = vadd.s32 256, %v2073_v47  ;;  %v527_v53 = vadd.s32 %v2077_v49, %v526_v44  ;;  %v2163_v43 = vsel %vm632_vm0, %v639_v30, %v544_v17  ;;  %v1608_v44 = vpop.eup %1607 }
  0x4b   : > { %1434 = vmatmul.mubr.f32.vlgmr.msra.gmra.mrb[4].mxu1 %v1965_v57 }
  0x4c   : > { %v528_v60 = vshrl.u32 %v527_v53, 2  ;;  %v2187_v52 = vmul.u32.u64.low 2454267026, %v2169_v48  ;;  %v2188_v53 = vmul.u32.u64.high 2454267026, %v2169_v48, %v2187_v52 }
  0x4d   : > { %975 = vmatmul.mubr.f32.gmra.mrb[6].mxu0 %v1965_v57  ;;  %v2087_v56 = vmul.u32.u64.low 2454267026, %v514_v7  ;;  %v2088_v57 = vmul.u32.u64.high 2454267026, %v514_v7, %v2087_v56 }
  0x4e   : > { %v529_v62 = vmul.u32 7, %v528_v60 }
  0x4f   : > { %vm553_vm2 = vc.u32 %v2087_v56, 2454267026  ;;  %v1610_v56 = vpop.eup %1609 }
  0x50   : > { %v554_v63 = vsel %vm553_vm2, 1, %v1658_v51  ;;  %v530_v3 = vsub.s32 %v2073_v47, %v529_v62  ;;  %vm634_vm2 = vmand %vm627_vm15, %vm620_vm14  ;;  %v582_v47 = vsel %vm581_vm3, 1, %v1658_v51  ;;  %v1612_v59 = vpop.eup %1611  ;;  %v385_v62 = vld [vmem:[%s2536_s1] sm:$0xff]  ;;  %vm609_vm15 = vc.u32 %v2187_v52, 2454267026 }
  0x51   : > { %v555_v2 = vadd.s32 %v2088_v57, %v554_v63  ;;  %v2174_v50 = vsel %vm634_vm2, %v641_v37, %v572_v22  ;;  %v583_v58 = vadd.s32 %v2154_v36, %v582_v47  ;;  %v372_v63 = vld [vmem:[%s2535_s0 + $0x8] sm:$0xff]  ;;  %v1614_v4 = vpop.eup %1613  ;;  %v610_v12 = vsel %vm609_vm15, 1, %v1658_v51  ;;  %v388_v22 = vld [vmem:[%s2536_s1 + $0x18] sm:$0xff]  ;;  %v381_v37 = vld [vmem:[%s2535_s0 + $0x50] sm:$0xf] }
  0x52   : > { %vm617_vm4 = vcmp.ne.s32.totalorder %v530_v3, 0  ;;  %vm624_vm5 = vcmp.lt.s32.totalorder %v530_v3, 0  ;;  %v638_v11 = vadd.s32 7, %v530_v3  ;;  %vm655_vm9 = vcmp.ge.s32.totalorder %v2174_v50, 3  ;;  %v1616_v9 = vpop.eup %1615 }
  0x53   : > { %v556_v8 = vshrl.u32 %v555_v2, 2  ;;  %vm631_vm6 = vmand %vm624_vm5, %vm617_vm4  ;;  %vm653_vm4 = vcmp.ge.s32.totalorder %v2163_v43, 3  ;;  %vm660_vm5 = vcmp.le.s32.totalorder %v2163_v43, 5  ;;  %vm662_vm10 = vcmp.le.s32.totalorder %v2174_v50, 5  ;;  %v373_v2 = vld [vmem:[%s2535_s0 + $0x10] sm:$0xff] }
  0x54   : > { %v2115_v16 = vsel %vm631_vm6, %v638_v11, %v530_v3  ;;  %vm595_vm6 = vc.u32 %v2160_v41, 2454267026  ;;  %vm2202_vm14 = vmand %vm655_vm9, %vm662_vm10  ;;  %v392_v41 = vld [vmem:[%s2536_s1 + $0x38] sm:$0xf] }
  0x55   : > { %v557_v13 = vmul.u32 7, %v556_v8  ;;  %vm652_vm7 = vcmp.ge.s32.totalorder %v2115_v16, 3  ;;  %vm659_vm8 = vcmp.le.s32.totalorder %v2115_v16, 5  ;;  %v596_v55 = vsel %vm595_vm6, 1, %v1658_v51 }
  0x56   : > { %vm2140_vm13 = vmand %vm652_vm7, %vm659_vm8  ;;  %v597_v1 = vadd.s32 %v2161_v42, %v596_v55  ;;  %v711_v6 = vsel %vm2202_vm14, %v1612_v59, %v2122_v21  ;;  %v584_v8 = vshrl.u32 %v583_v58, 2  ;;  %v378_v21 = vld [vmem:[%s2535_s0 + $0x38] sm:$0xf] }
  0x57   : > { %v558_v20 = vsub.s32 %v514_v7, %v557_v13  ;;  %v708_v49 = vsel %vm2140_vm13, %v1606_v39, %v2109_v5  ;;  %v371_v7 = vld [vmem:[%s2535_s0] sm:$0xff]  ;;  %v374_v5 = vld [vmem:[%s2535_s0 + $0x18] sm:$0xff]  ;;  %v1618_v13 = vpop.eup %1617  ;;  %v715_v51 = vsel %vm2140_vm13, %v1614_v4, %v2132_v26 }
  0x58   : > { %v722_v60 = vmul.f32 %v708_v49, %v371_v7  ;;  %v598_v17 = vshrl.u32 %v597_v1, 2  ;;  %v585_v30 = vmul.u32 7, %v584_v8  ;;  %v2281_v49 = vld [vmem:[%s2103_s16 + $0x20] sm:$0xff] }
  0x59   : > { %vm619_vm11 = vcmp.ne.s32.totalorder %v558_v20, 0  ;;  %vm626_vm12 = vcmp.lt.s32.totalorder %v558_v20, 0  ;;  %v640_v31 = vadd.s32 7, %v558_v20 }
  0x5a   : > { %vm633_vm1 = vmand %vm626_vm12, %vm619_vm11  ;;  %v2228_v10 = vadd.f32 %v722_v60, %v385_v62  ;;  %v599_v39 = vmul.u32 7, %v598_v17  ;;  %v586_v47 = vsub.s32 %v2128_v24, %v585_v30  ;;  %v395_v24 = vld [vmem:[%s2536_s1 + $0x50] sm:$0xf]  ;;  %v688_v60 = vmul.f32 1.442695, %v2281_v49 }
  0x5b   : > { %v2166_v46 = vsel %vm633_vm1, %v640_v31, %v558_v20  ;;  %vm2192_vm11 = vmand %vm653_vm4, %vm660_vm5  ;;  %v725_v20 = vmul.f32 %v711_v6, %v374_v5  ;;  %v611_v31 = vadd.s32 %v2188_v53, %v610_v12  ;;  %v394_v53 = vld [vmem:[%s2536_s1 + $0x48] sm:$0xf] }
  0x5c   : > { %vm654_vm7 = vcmp.ge.s32.totalorder %v2166_v46, 3  ;;  %vm661_vm8 = vcmp.le.s32.totalorder %v2166_v46, 5  ;;  %v709_v0 = vsel %vm2192_vm11, %v1608_v44, %v2113_v14  ;;  %v386_v14 = vld [vmem:[%s2536_s1 + $0x8] sm:$0xff]  ;;  %v716_v25 = vsel %vm2192_vm11, %v1616_v9, %v2135_v27 }
  0x5d   : > { %vm2197_vm12 = vmand %vm654_vm7, %vm661_vm8  ;;  %v723_v11 = vmul.f32 %v709_v0, %v372_v63  ;;  %v2254_v33 = vadd.f32 -0.7853982, %v2228_v10  ;;  %v729_v27 = vmul.f32 %v715_v51, %v378_v21  ;;  %v2272_v40 = vadd.f32 %v725_v20, %v388_v22  ;;  %v2285_v44 = vld [vmem:[%s2103_s16 + $0x28] sm:$0xff]  ;;  %v2341_v21 = vld [vmem:[%s2103_s16 + $0x58] sm:$0xf] }
  0x5e   : > { %v710_v3 = vsel %vm2197_vm12, %v1610_v56, %v2118_v18  ;;  %v1620_v18 = vpop.eup %1619  ;;  %v717_v35 = vsel %vm2197_vm12, %v1618_v13, %v2145_v32  ;;  %v730_v42 = vmul.f32 %v716_v25, %v379_v23  ;;  %v393_v32 = vld [vmem:[%s2536_s1 + $0x40] sm:$0xf]  ;;  %v600_v57 = vsub.s32 %v2138_v28, %v599_v39  ;;  %v2316_v28 = vld [vmem:[%s2103_s16 + $0x68] sm:$0xf]  ;;  %v2331_v13 = vld [vmem:[%s2103_s16 + $0x30] sm:$0xff] }
  0x5f   : > { %v724_v15 = vmul.f32 %v710_v3, %v373_v2  ;;  %v2256_v26 = vadd.f32 %v723_v11, %v386_v14  ;;  %v718_v38 = vsel %vm2202_vm14, %v1620_v18, %v2150_v34  ;;  %v731_v45 = vmul.f32 %v717_v35, %v380_v29  ;;  %v2346_v25 = vld [vmem:[%s2103_s16 + $0x60] sm:$0xf] }
  0x60   : > { %v612_v34 = vshrl.u32 %v611_v31, 2  ;;  %v1071_v7 = vmul.f32 0.31830987, %v2254_v33  ;;  %v732_v54 = vmul.f32 %v718_v38, %v381_v37  ;;  %v2297_v56 = vadd.f32 %v729_v27, %v392_v41 }
  0x61   : > { %v2264_v36 = vadd.f32 %v724_v15, %v387_v19  ;;  %v2289_v52 = vadd.f32 -0.7853982, %v2256_v26  ;;  %v2304_v58 = vadd.f32 -0.7853982, %v2272_v40  ;;  %v2306_v59 = vadd.f32 %v730_v42, %v393_v32 }
  0x62   : > { %v690_v61 = vmul.f32 1.442695, %v2285_v44  ;;  %v2310_v62 = vadd.f32 %v731_v45, %v394_v53  ;;  %vm621_vm13 = vcmp.ne.s32.totalorder %v586_v47, 0  ;;  %vm628_vm0 = vcmp.lt.s32.totalorder %v586_v47, 0 }
  0x63   : > { %v2295_v55 = vadd.f32 -0.7853982, %v2264_v36  ;;  %v613_v63 = vmul.u32 7, %v612_v34  ;;  %v1099_v0 = vfloor.f32 %v1071_v7  ;;  %v1072_v1 = vmul.f32 0.31830987, %v2289_v52  ;;  %vm635_vm3 = vmand %vm628_vm0, %vm621_vm13 }
  0x64   : > { %v2313_v2 = vadd.f32 %v732_v54, %v395_v24  ;;  %v2319_v3 = vadd.f32 -0.7853982, %v2297_v56  ;;  %v642_v4 = vadd.s32 7, %v586_v47  ;;  %vm622_vm1 = vcmp.ne.s32.totalorder %v600_v57, 0 }
  0x65   : > { %vm629_vm2 = vcmp.lt.s32.totalorder %v600_v57, 0  ;;  %v1073_v5 = vmul.f32 0.31830987, %v2295_v55  ;;  %v1074_v6 = vmul.f32 0.31830987, %v2304_v58  ;;  %1621 = vpow2.f32 %v688_v60 }
  0x66   : > { %v2324_v8 = vadd.f32 -0.7853982, %v2306_v59  ;;  %v2327_v9 = vadd.f32 -0.7853982, %v2310_v62  ;;  %v643_v11 = vadd.s32 7, %v600_v57  ;;  %1623 = vpow2.f32 %v690_v61  ;;  %vm636_vm4 = vmand %vm629_vm2, %vm622_vm1 }
  0x67   : > { %v614_v12 = vsub.s32 %v2169_v48, %v613_v63  ;;  %v2334_v14 = vadd.f32 -0.7853982, %v2313_v2  ;;  %v706_v15 = vmul.f32 1.442695, %v2316_v28  ;;  %v1113_v17 = vmul.f32 3.1415927, %v1099_v0 }
  0x68   : > { %v1100_v18 = vfloor.f32 %v1072_v1  ;;  %v1078_v19 = vmul.f32 0.31830987, %v2319_v3  ;;  %v2338_v20 = vsel %vm635_vm3, %v642_v4, %v586_v47  ;;  %v1101_v51 = vfloor.f32 %v1073_v5 }
  0x69   : > { %v1102_v22 = vfloor.f32 %v1074_v6  ;;  %v1079_v48 = vmul.f32 0.31830987, %v2324_v8  ;;  %v692_v23 = vmul.f32 1.442695, %v2331_v13  ;;  %v1080_v30 = vmul.f32 0.31830987, %v2327_v9 }
  0x6a   : > { %v2349_v31 = vsel %vm636_vm4, %v643_v11, %v600_v57  ;;  %vm623_vm5 = vcmp.ne.s32.totalorder %v614_v12, 0  ;;  %vm630_vm6 = vcmp.lt.s32.totalorder %v614_v12, 0  ;;  %v1081_v29 = vmul.f32 0.31830987, %v2334_v14  ;;  %v375_v11 = vld [vmem:[%s2535_s0 + $0x20] sm:$0xff] }
  0x6b   : > { %vm656_vm7 = vcmp.ge.s32.totalorder %v2338_v20, 3  ;;  %1625 = vpow2.f32 %v706_v15  ;;  %v702_v35 = vmul.f32 1.442695, %v2341_v21  ;;  %v1106_v27 = vfloor.f32 %v1078_v19  ;;  %vm637_vm11 = vmand %vm630_vm6, %vm623_vm5 }
  0x6c   : > { %vm663_vm8 = vcmp.le.s32.totalorder %v2338_v20, 5  ;;  %v644_v37 = vadd.s32 7, %v614_v12  ;;  %v704_v38 = vmul.f32 1.442695, %v2346_v25  ;;  %v1114_v39 = vmul.f32 3.1415927, %v1100_v18 }
  0x6d   : > { %v1107_v41 = vfloor.f32 %v1079_v48  ;;  %vm657_vm9 = vcmp.ge.s32.totalorder %v2349_v31, 3  ;;  %vm664_vm10 = vcmp.le.s32.totalorder %v2349_v31, 5  ;;  %v1115_v42 = vmul.f32 3.1415927, %v1101_v51  ;;  %vm2360_vm12 = vmand %vm656_vm7, %vm663_vm8  ;;  %v389_v48 = vld [vmem:[%s2536_s1 + $0x20] sm:$0xff] }
  0x6e   : > { %v1116_v32 = vmul.f32 3.1415927, %v1102_v22  ;;  %v1108_v45 = vfloor.f32 %v1080_v30  ;;  %1627 = vpow2.f32 %v692_v23  ;;  %v1109_v34 = vfloor.f32 %v1081_v29  ;;  %vm2364_vm14 = vmand %vm657_vm9, %vm664_vm10  ;;  %v384_v29 = vld [vmem:[%s2535_s0 + $0x68] sm:$0xf] }
  0x6f   : > { %v1622_v47 = vpop.eup %1621  ;;  %1629 = vpow2.f32 %v702_v35  ;;  %v1120_v54 = vmul.f32 3.1415927, %v1106_v27  ;;  %v2368_v57 = vsel %vm637_vm11, %v644_v37, %v614_v12  ;;  %v1127_v60 = vsub.f32 %v2254_v33, %v1113_v17  ;;  %v376_v33 = vld [vmem:[%s2535_s0 + $0x28] sm:$0xff] }
  0x70   : > { %v1624_v53 = vpop.eup %1623  ;;  %1631 = vpow2.f32 %v704_v38  ;;  %v1128_v61 = vsub.f32 %v2289_v52, %v1114_v39  ;;  %v1121_v63 = vmul.f32 3.1415927, %v1107_v41  ;;  %v1129_v0 = vsub.f32 %v2295_v55, %v1115_v42 }
  0x71   : > { %v1130_v1 = vsub.f32 %v2304_v58, %v1116_v32  ;;  %v1122_v4 = vmul.f32 3.1415927, %v1108_v45  ;;  %v712_v5 = vsel %vm2360_vm12, %v1622_v47, %v2281_v49  ;;  %v1123_v6 = vmul.f32 3.1415927, %v1109_v34 }
  0x72   : > { %v713_v52 = vsel %vm2364_vm14, %v1624_v53, %v2285_v44  ;;  %vm658_vm15 = vcmp.ge.s32.totalorder %v2368_v57, 3  ;;  %vm665_vm13 = vcmp.le.s32.totalorder %v2368_v57, 5  ;;  %v1134_v55 = vsub.f32 %v2319_v3, %v1120_v54 }
  0x73   : > { %vm673_vm0 = vcmp.eq.s32.totalorder %v2115_v16, 6  ;;  %v1141_v58 = vadd.f32 0.7853982, %v1127_v60  ;;  %v1142_v12 = vadd.f32 0.7853982, %v1128_v61  ;;  %v1135_v15 = vsub.f32 %v2324_v8, %v1121_v63  ;;  %vm2393_vm2 = vmand %vm658_vm15, %vm665_vm13  ;;  %v390_v8 = vld [vmem:[%s2536_s1 + $0x28] sm:$0xff] }
  0x74   : > { %vm674_vm1 = vcmp.eq.s32.totalorder %v2163_v43, 6  ;;  %v1136_v17 = vsub.f32 %v2327_v9, %v1122_v4  ;;  %v726_v18 = vmul.f32 %v712_v5, %v375_v11  ;;  %v727_v19 = vmul.f32 %v713_v52, %v376_v33  ;;  %v382_v5 = vld [vmem:[%s2535_s0 + $0x58] sm:$0xf] }
  0x75   : > { %v1626_v49 = vpop.eup %1625  ;;  %v1143_v51 = vadd.f32 0.7853982, %v1129_v0  ;;  %v1144_v22 = vadd.f32 0.7853982, %v1130_v1  ;;  %v1137_v3 = vsub.f32 %v2334_v14, %v1123_v6  ;;  %vm675_vm3 = vcmp.eq.s32.totalorder %v2166_v46, 6 }
  0x76   : > { %v1148_v30 = vadd.f32 0.7853982, %v1134_v55  ;;  %vm676_vm4 = vcmp.eq.s32.totalorder %v2174_v50, 6  ;;  %v1149_v37 = vadd.f32 0.7853982, %v1135_v15  ;;  %v721_v38 = vsel %vm2393_vm2, %v1626_v49, %v2316_v28  ;;  %v377_v28 = vld [vmem:[%s2535_s0 + $0x30] sm:$0xff] }
  0x77   : > { %v1150_v32 = vadd.f32 0.7853982, %v1136_v17  ;;  %v2412_v45 = vadd.f32 %v726_v18, %v389_v48  ;;  %v2414_v47 = vadd.f32 %v727_v19, %v390_v8  ;;  %v1151_v60 = vadd.f32 0.7853982, %v1137_v3  ;;  %v383_v55 = vld [vmem:[%s2535_s0 + $0x60] sm:$0xf] }
  0x78   : > { %v1628_v23 = vpop.eup %1627  ;;  %v735_v4 = vmul.f32 %v721_v38, %v384_v29  ;;  %vm677_vm5 = vcmp.eq.s32.totalorder %v2338_v20, 6  ;;  %vm678_vm6 = vcmp.eq.s32.totalorder %v2349_v31, 6  ;;  %vm679_vm7 = vcmp.eq.s32.totalorder %v2368_v57, 6 }
  0x79   : > { %v1630_v35 = vpop.eup %1629  ;;  %v714_v61 = vsel %vm2393_vm2, %v1628_v23, %v2331_v13  ;;  %v1371_v43 = vadd.f32 -0.7853982, %v2414_v47 }
  0x7a   : > { %v1632_v39 = vpop.eup %1631  ;;  %v719_v6 = vsel %vm2360_vm12, %v1630_v35, %v2341_v21  ;;  %v728_v15 = vmul.f32 %v714_v61, %v377_v28 }
  0x7b   : > { %v720_v49 = vsel %vm2364_vm14, %v1632_v39, %v2346_v25  ;;  %v733_v19 = vmul.f32 %v719_v6, %v382_v5  ;;  %v1076_v38 = vmul.f32 0.31830987, %v1371_v43 }
  0x7c   : > { %v734_v3 = vmul.f32 %v720_v49, %v383_v55 }
  0xfc   : > { %v816_v9 = vpop.f32.mrb[0].mxu0 }
  0xfd   : > { %v1155_v14 = vmul.f32 3.1415927, %v816_v9  ;;  %v818_v27 = vpop.f32.mrb[1].mxu0 }
  0xfe   : > { %v1156_v41 = vmul.f32 3.1415927, %v818_v27  ;;  %v893_v42 = vpop.f32.mrb[0].mxu1 }
  0xff   : > { %v1169_v34 = vadd.f32 %v1155_v14, %v1141_v58  ;;  %v1157_v53 = vmul.f32 3.1415927, %v893_v42  ;;  %v895_v54 = vpop.f32.mrb[1].mxu1 }
 0x100   : > { %v1170_v63 = vadd.f32 %v1156_v41, %v1142_v12  ;;  %v1158_v0 = vmul.f32 3.1415927, %v895_v54  ;;  %v822_v1 = vpop.f32.mrb[2].mxu0  ;;  %v398_v12 = vld [vmem:[%s2536_s1 + $0x68] sm:$0xf] }
 0x101   : > { %v1183_v11 = vsel %vm673_vm0, %v1169_v34, %v2228_v10  ;;  %v1171_v33 = vadd.f32 %v1157_v53, %v1143_v51  ;;  %v1162_v52 = vmul.f32 3.1415927, %v822_v1  ;;  %v824_v13 = vpop.f32.mrb[3].mxu0  ;;  %v2469_v23 = vadd.f32 %v735_v4, %v398_v12 }
 0x102   : > { %1197 = vst [vmem:[%s2421_s28] sm:$0xff] %v1183_v11  ;;  %v1184_v21 = vsel %vm674_vm1, %v1170_v63, %v2256_v26  ;;  %v1172_v7 = vadd.f32 %v1158_v0, %v1144_v22  ;;  %v1163_v58 = vmul.f32 3.1415927, %v824_v13  ;;  %v899_v10 = vpop.f32.mrb[2].mxu1  ;;  %v391_v26 = vld [vmem:[%s2536_s1 + $0x30] sm:$0xff] }
 0x103   : > { %1198 = vst [vmem:[%s2421_s28 + $0x8] sm:$0xff] %v1184_v21  ;;  %v1185_v24 = vsel %vm675_vm3, %v1171_v33, %v2264_v36  ;;  %v1176_v25 = vadd.f32 %v1162_v52, %v1148_v30  ;;  %v1164_v17 = vmul.f32 3.1415927, %v899_v10  ;;  %v901_v18 = vpop.f32.mrb[3].mxu1  ;;  %v396_v36 = vld [vmem:[%s2536_s1 + $0x58] sm:$0xf]  ;;  %v2478_v29 = vadd.f32 %v728_v15, %v391_v26 }
 0x104   : > { %1199 = vst [vmem:[%s2421_s28 + $0x10] sm:$0xff] %v1185_v24  ;;  %v1186_v44 = vsel %vm676_vm4, %v1172_v7, %v2272_v40  ;;  %v1177_v51 = vadd.f32 %v1163_v58, %v1149_v37  ;;  %v1165_v22 = vmul.f32 3.1415927, %v901_v18  ;;  %v397_v40 = vld [vmem:[%s2536_s1 + $0x60] sm:$0xf]  ;;  %v2485_v35 = vadd.f32 %v733_v19, %v396_v36 }
 0x105   : > { %1200 = vst [vmem:[%s2421_s28 + $0x18] sm:$0xff] %v1186_v44  ;;  %v1190_v48 = vsel %vm673_vm0, %v1176_v25, %v2297_v56  ;;  %v1178_v8 = vadd.f32 %v1164_v17, %v1150_v32  ;;  %v1370_v56 = vadd.f32 -0.7853982, %v2412_v45  ;;  %v1379_v27 = vadd.f32 -0.7853982, %v2469_v23 }
 0x106   : > { %1204 = vst [vmem:[%s2421_s28 + $0x38] sm:$0xf] %v1190_v48  ;;  %v1191_v9 = vsel %vm674_vm1, %v1177_v51, %v2306_v59  ;;  %v1179_v30 = vadd.f32 %v1165_v22, %v1151_v60  ;;  %v2492_v59 = vadd.f32 %v734_v3, %v397_v40  ;;  %v1372_v37 = vadd.f32 -0.7853982, %v2478_v29 }
 0x107   : > { %1205 = vst [vmem:[%s2421_s28 + $0x40] sm:$0xf] %v1191_v9  ;;  %v1192_v16 = vsel %vm675_vm3, %v1178_v8, %v2310_v62  ;;  %v1075_v46 = vmul.f32 0.31830987, %v1370_v56  ;;  %v1377_v62 = vadd.f32 -0.7853982, %v2485_v35 }
 0x108   : > { %1206 = vst [vmem:[%s2421_s28 + $0x48] sm:$0xf] %v1192_v16  ;;  %v1193_v14 = vsel %vm676_vm4, %v1179_v30, %v2313_v2  ;;  %v1378_v39 = vadd.f32 -0.7853982, %v2492_v59  ;;  %v1084_v41 = vmul.f32 0.31830987, %v1379_v27  ;;  %v1104_v2 = vfloor.f32 %v1076_v38 }
 0x109   : > { %1207 = vst [vmem:[%s2421_s28 + $0x50] sm:$0xf] %v1193_v14  ;;  %v1077_v42 = vmul.f32 0.31830987, %v1372_v37  ;;  %v1103_v32 = vfloor.f32 %v1075_v46  ;;  %v1082_v50 = vmul.f32 0.31830987, %v1377_v62 }
 0x10a   : > { %v1083_v34 = vmul.f32 0.31830987, %v1378_v39  ;;  %v1112_v53 = vfloor.f32 %v1084_v41  ;;  %v1118_v61 = vmul.f32 3.1415927, %v1104_v2 }
 0x10b   : > { %v1105_v54 = vfloor.f32 %v1077_v42  ;;  %v1117_v60 = vmul.f32 3.1415927, %v1103_v32  ;;  %v1110_v28 = vfloor.f32 %v1082_v50 }
 0x10c   : > { %v1111_v63 = vfloor.f32 %v1083_v34  ;;  %v1126_v0 = vmul.f32 3.1415927, %v1112_v53  ;;  %v1132_v6 = vsub.f32 %v1371_v43, %v1118_v61 }
 0x10d   : > { %v1119_v1 = vmul.f32 3.1415927, %v1105_v54  ;;  %v1131_v4 = vsub.f32 %v1370_v56, %v1117_v60  ;;  %v1124_v5 = vmul.f32 3.1415927, %v1110_v28 }
 0x10e   : > { %v1125_v11 = vmul.f32 3.1415927, %v1111_v63  ;;  %v1140_v33 = vsub.f32 %v1379_v27, %v1126_v0  ;;  %v1146_v21 = vadd.f32 0.7853982, %v1132_v6 }
 0x10f   : > { %v1133_v52 = vsub.f32 %v1372_v37, %v1119_v1  ;;  %v1145_v13 = vadd.f32 0.7853982, %v1131_v4  ;;  %v1138_v55 = vsub.f32 %v1377_v62, %v1124_v5 }
 0x110   : > { %v1139_v7 = vsub.f32 %v1378_v39, %v1125_v11  ;;  %v1154_v12 = vadd.f32 0.7853982, %v1140_v33 }
 0x111   : > { %v1147_v25 = vadd.f32 0.7853982, %v1133_v52  ;;  %v1152_v19 = vadd.f32 0.7853982, %v1138_v55 }
 0x112   : > { %v1153_v36 = vadd.f32 0.7853982, %v1139_v7 }
 0x11c   : > { %v970_v49 = vpop.f32.mrb[4].mxu0 }
 0x11d   : > { %v1159_v58 = vmul.f32 3.1415927, %v970_v49  ;;  %v972_v10 = vpop.f32.mrb[5].mxu0 }
 0x11e   : > { %v1160_v15 = vmul.f32 3.1415927, %v972_v10  ;;  %v1435_v24 = vpop.f32.mrb[4].mxu1 }
 0x11f   : > { %v1173_v17 = vadd.f32 %v1159_v58, %v1145_v13  ;;  %v1168_v18 = vmul.f32 3.1415927, %v1435_v24  ;;  %v1047_v26 = vpop.f32.mrb[5].mxu1 }
 0x120   : > { %v1174_v44 = vadd.f32 %v1160_v15, %v1146_v21  ;;  %v976_v51 = vpop.f32.mrb[6].mxu0  ;;  %v1161_v22 = vmul.f32 3.1415927, %v1047_v26 }
 0x121   : > { %v1187_v3 = vsel %vm677_vm5, %v1173_v17, %v2412_v45  ;;  %v1182_v48 = vadd.f32 %v1168_v18, %v1154_v12  ;;  %v1166_v8 = vmul.f32 3.1415927, %v976_v51  ;;  %v978_v40 = vpop.f32.mrb[7].mxu0 }
 0x122   : > { %1201 = vst [vmem:[%s2421_s28 + $0x20] sm:$0xff] %v1187_v3  ;;  %v1188_v9 = vsel %vm678_vm6, %v1174_v44, %v2414_v47  ;;  %v1175_v30 = vadd.f32 %v1161_v22, %v1147_v25  ;;  %v1167_v16 = vmul.f32 3.1415927, %v978_v40 }
 0x123   : > { %1202 = vst [vmem:[%s2421_s28 + $0x28] sm:$0xff] %v1188_v9  ;;  %v1196_v56 = vsel %vm679_vm7, %v1182_v48, %v2469_v23  ;;  %v1180_v14 = vadd.f32 %v1166_v8, %v1152_v19 }
 0x124   : > { %1210 = vst [vmem:[%s2421_s28 + $0x68] sm:$0xf] %v1196_v56  ;;  %v1189_v45 = vsel %vm679_vm7, %v1175_v30, %v2478_v29  ;;  %v1181_v43 = vadd.f32 %v1167_v16, %v1153_v36 }
 0x125   : > { %v1194_v27 = vsel %vm677_vm5, %v1180_v14, %v2485_v35  ;;  %1203 = vst [vmem:[%s2421_s28 + $0x30] sm:$0xff] %v1189_v45 }
 0x126   : > { %1208 = vst [vmem:[%s2421_s28 + $0x58] sm:$0xf] %v1194_v27  ;;  %v1195_v47 = vsel %vm678_vm6, %v1181_v43, %v2492_v59 }
 0x127   : > { %1209 = vst [vmem:[%s2421_s28 + $0x60] sm:$0xf] %v1195_v47 }
 0x128 PF: > { %s15_s20 = sadd.s32 1, %s1655_s20   ;;  %s2555_s18 = smov %s1651_s19 }
 0x129   : > { %p12_p5 = scmp.ge.s32.totalorder %s15_s20, 4   ;;  %s2556_s19 = smov %s2558_s21 }
 0x12b   :  { %14 = sbr.rel (!%p12_p5) target bundleno = 2 (0x2), region = 79 }

</bundles_post_ra>
